<compile_context>
chip_gen: v6e
topology: v6e:2x2x1
jax: 0.10.0
libtpu: 0.0.40
codegen_flags: <defaults>
</compile_context>

<pallas_src>
import jax
import jax.numpy as jnp
from jax.experimental import pallas as pl
from jax.experimental.pallas import tpu as pltpu

LOG_STD_MAX = 2.0
LOG_STD_MIN = -5.0

_VMEM_LIMIT = 32 * 1024 * 1024  # explicit scoped-VMEM limit (v5e default is 16 MiB)


def _mlp_mean_kernel(obs_ref, w1_ref, b1_ref, w2_ref, b2_ref, w3_ref, b3_ref,
                     mean_ref):
    """Fused 3-layer MLP (Linear+ReLU, Linear+ReLU, Linear) -> mean tile.

    obs/weights are bf16 MXU operands; accumulation / bias / ReLU are f32.
    """
    x = obs_ref[...]                                                     # (TB, S) bf16
    h1 = jnp.dot(x, w1_ref[...], preferred_element_type=jnp.float32) + b1_ref[...]
    h1 = jnp.maximum(h1, 0.0)                                            # ReLU
    h2 = jnp.dot(h1.astype(jnp.bfloat16), w2_ref[...],
                 preferred_element_type=jnp.float32) + b2_ref[...]
    h2 = jnp.maximum(h2, 0.0)                                            # ReLU
    mean = jnp.dot(h2.astype(jnp.bfloat16), w3_ref[...],
                   preferred_element_type=jnp.float32) + b3_ref[...]
    mean_ref[...] = mean.astype(mean_ref.dtype)                          # (TB, A)


def _mean_single_block(obs, w1, b1, w2, b2, w3, b3):
    """Small/medium batch: no grid, whole problem in VMEM (no pipelining)."""
    B = obs.shape[0]
    A = w3.shape[1]
    vmem = pl.BlockSpec(memory_space=pltpu.MemorySpace.VMEM)
    return pl.pallas_call(
        _mlp_mean_kernel,
        out_shape=jax.ShapeDtypeStruct((B, A), jnp.float32),
        in_specs=[vmem] * 7,
        out_specs=vmem,
        compiler_params=pltpu.CompilerParams(vmem_limit_bytes=_VMEM_LIMIT),
    )(obs, w1, b1, w2, b2, w3, b3)


def _choose_tile(B, max_tile):
    """Pick a batch tile (multiple of 8, <= max_tile) giving an even, balanced grid."""
    num_tiles = pl.cdiv(B, max_tile)
    if num_tiles > 1 and num_tiles % 2 == 1:
        num_tiles += 1                       # balance across v7x's 2 TensorCores
    tb = pl.cdiv(B, num_tiles)
    tb = ((tb + 7) // 8) * 8                 # sublane (multiple-of-8) constraint
    return min(tb, max_tile)


def _mean_batched(obs, w1, b1, w2, b2, w3, b3, *, batch_tile):
    """Large batch: batch-tiled parallel grid, weights resident in VMEM.

    No padding: the ragged edge block is clipped by Pallas (OOB writes masked);
    rows are independent so garbage edge rows cannot contaminate valid output.
    """
    B, S = obs.shape
    H = w1.shape[1]
    A = w3.shape[1]
    TB = _choose_tile(B, batch_tile)
    num_tiles = pl.cdiv(B, TB)

    def const(shape):
        # constant index_map -> block never changes -> stays resident in VMEM
        return pl.BlockSpec(shape, lambda i: (0,) * len(shape))

    return pl.pallas_call(
        _mlp_mean_kernel,
        out_shape=jax.ShapeDtypeStruct((B, A), jnp.float32),
        grid=(num_tiles,),
        in_specs=[pl.BlockSpec((TB, S), lambda i: (i, 0)),
                  const((S, H)), const((1, H)),
                  const((H, H)), const((1, H)),
                  const((H, A)), const((1, A))],
        out_specs=pl.BlockSpec((TB, A), lambda i: (i, 0)),
        compiler_params=pltpu.CompilerParams(
            dimension_semantics=("parallel",),        # megacore on v7x
            vmem_limit_bytes=_VMEM_LIMIT),
    )(obs, w1, b1, w2, b2, w3, b3)


def gaussian_policy_forward(obs, w1, b1, w2, b2, w3, b3, log_std, *,
                            batch_tile=2048, single_block_max=1024):
    """Returns (mean, scale_tril) — the parameters of the MultivariateNormal."""
    B = obs.shape[0]
    H = w1.shape[1]
    A = w3.shape[1]

    # obs streamed as bf16 (halves per-tile DMA). Weights should already be
    # stored bf16 (see init_params); cast here only if a caller passed f32.
    obs_b = obs.astype(jnp.bfloat16)
    w1b = w1 if w1.dtype == jnp.bfloat16 else w1.astype(jnp.bfloat16)
    w2b = w2 if w2.dtype == jnp.bfloat16 else w2.astype(jnp.bfloat16)
    w3b = w3 if w3.dtype == jnp.bfloat16 else w3.astype(jnp.bfloat16)
    b1_2d = b1.reshape(1, H).astype(jnp.float32)
    b2_2d = b2.reshape(1, H).astype(jnp.float32)
    b3_2d = b3.reshape(1, A).astype(jnp.float32)

    if B <= single_block_max:
        mean = _mean_single_block(obs_b, w1b, b1_2d, w2b, b2_2d, w3b, b3_2d)
    else:
        mean = _mean_batched(obs_b, w1b, b1_2d, w2b, b2_2d, w3b, b3_2d,
                             batch_tile=batch_tile)

    # scale_tril depends only on parameters (not obs / batch) -> outside kernel.
    std = jnp.exp(jnp.clip(log_std, LOG_STD_MIN, LOG_STD_MAX))
    scale_tril = jnp.diag(std)
    return mean, scale_tril


def init_params(key, state_dim, act_dim, hidden_dim):
    """Mimics PyTorch nn.Linear default init; matmul weights stored bf16 once."""
    ks = jax.random.split(key, 6)

    def linear(kw, kb, fan_in, fan_out):
        bound = 1.0 / jnp.sqrt(fan_in)
        w = jax.random.uniform(kw, (fan_in, fan_out), jnp.float32, -bound, bound)
        b = jax.random.uniform(kb, (fan_out,), jnp.float32, -bound, bound)
        return w.astype(jnp.bfloat16), b       # weights bf16 up-front, biases f32

    w1, b1 = linear(ks[0], ks[1], state_dim, hidden_dim)
    w2, b2 = linear(ks[2], ks[3], hidden_dim, hidden_dim)
    w3, b3 = linear(ks[4], ks[5], hidden_dim, act_dim)
    log_std = jnp.zeros((act_dim,), jnp.float32)   # nn.Parameter(torch.zeros(act_dim))
    return w1, b1, w2, b2, w3, b3, log_std


def reference_forward(obs, w1, b1, w2, b2, w3, b3, log_std):
    """Pure-JAX reference with the same bf16-operand / f32-accumulate contract."""
    def dot_bf16(a, b):
        return jnp.dot(a.astype(jnp.bfloat16), b.astype(jnp.bfloat16),
                       preferred_element_type=jnp.float32)
    h1 = jnp.maximum(dot_bf16(obs, w1) + b1, 0.0)
    h2 = jnp.maximum(dot_bf16(h1, w2) + b2, 0.0)
    mean = dot_bf16(h2, w3) + b3
    std = jnp.exp(jnp.clip(log_std, LOG_STD_MIN, LOG_STD_MAX))
    return mean, jnp.diag(std)


if __name__ == "__main__":
    # shapes consistent with GaussianPolicy(state_dim, act_dim, max_action, hidden_dim=256)
    STATE_DIM, ACT_DIM, HIDDEN_DIM = 16, 8, 256

    key = jax.random.PRNGKey(0)
    k_obs_s, k_obs_l, k_params = jax.random.split(key, 3)
    params = init_params(k_params, STATE_DIM, ACT_DIM, HIDDEN_DIM)

    # 1) small batch -> single-block (no-grid) path
    obs_small = jax.random.normal(k_obs_s, (8, STATE_DIM), jnp.float32)
    mean_s, tril_s = gaussian_policy_forward(obs_small, *params)
    jax.block_until_ready((mean_s, tril_s))
    ref_mean_s, ref_tril_s = reference_forward(obs_small, *params)
    assert jnp.allclose(mean_s, ref_mean_s, atol=1e-3, rtol=1e-3)
    assert jnp.allclose(tril_s, ref_tril_s, atol=1e-6, rtol=1e-6)

    # 2) non-tile-multiple batch forced onto the batched (gridded) path.
    #    Exercises edge-block clipping (no pad/slice) and the even-grid tiling.
    obs_large = jax.random.normal(k_obs_l, (600, STATE_DIM), jnp.float32)
    mean_l, tril_l = gaussian_policy_forward(obs_large, *params,
                                             batch_tile=256, single_block_max=128)
    jax.block_until_ready((mean_l, tril_l))
    ref_mean_l, ref_tril_l = reference_forward(obs_large, *params)
    assert jnp.allclose(mean_l, ref_mean_l, atol=1e-3, rtol=1e-3)
    assert jnp.allclose(tril_l, ref_tril_l, atol=1e-6, rtol=1e-6)

    # TODO(synk): MultivariateNormal object / dist.sample() and the max_action
    # clamp in act()/batch_act() are host-side glue outside the forward hot
    # path; not implemented in the kernel.
    print("KERNEL_OK")
</pallas_src>

<mosaic_0001>
module attributes {stable_mosaic.version = 11 : i64} {
  func.func @_mlp_mean_kernel(%arg0: memref<8x16xbf16, #tpu.memory_space<vmem>>, %arg1: memref<16x256xbf16, #tpu.memory_space<vmem>>, %arg2: memref<1x256xf32, #tpu.memory_space<vmem>>, %arg3: memref<256x256xbf16, #tpu.memory_space<vmem>>, %arg4: memref<1x256xf32, #tpu.memory_space<vmem>>, %arg5: memref<256x8xbf16, #tpu.memory_space<vmem>>, %arg6: memref<1x8xf32, #tpu.memory_space<vmem>>, %arg7: memref<8x8xf32, #tpu.memory_space<vmem>>) attributes {dimension_semantics = [], scalar_prefetch = 0 : i64, scratch_operands = 0 : i64, tpu.core_type = #tpu.core_type<tc>} {
    %c0 = arith.constant 0 : index
    %c0_0 = arith.constant 0 : index
    %0 = vector.load %arg0[%c0, %c0_0] : memref<8x16xbf16, #tpu.memory_space<vmem>>, vector<8x16xbf16>
    %c0_1 = arith.constant 0 : index
    %c0_2 = arith.constant 0 : index
    %1 = vector.load %arg1[%c0_1, %c0_2] : memref<16x256xbf16, #tpu.memory_space<vmem>>, vector<16x256xbf16>
    %cst = arith.constant dense<0.000000e+00> : vector<8x256xf32>
    %2 = tpu.matmul %0, %1, %cst {dimension_numbers = #tpu.dot_dimension_numbers<[1], [0], [0], [1], [0, 0, 1, 1], [], []>} : vector<8x16xbf16>, vector<16x256xbf16>, vector<8x256xf32> -> vector<8x256xf32>
    %c0_3 = arith.constant 0 : index
    %c0_4 = arith.constant 0 : index
    %3 = vector.load %arg2[%c0_3, %c0_4] : memref<1x256xf32, #tpu.memory_space<vmem>>, vector<1x256xf32>
    %4 = vector.broadcast %3 : vector<1x256xf32> to vector<8x256xf32>
    %5 = arith.addf %2, %4 : vector<8x256xf32>
    %cst_5 = arith.constant 0.000000e+00 : f32
    %6 = vector.broadcast %cst_5 : f32 to vector<8x256xf32>
    %7 = arith.maximumf %5, %6 : vector<8x256xf32>
    %8 = arith.truncf %7 : vector<8x256xf32> to vector<8x256xbf16>
    %c0_6 = arith.constant 0 : index
    %c0_7 = arith.constant 0 : index
    %9 = vector.load %arg3[%c0_6, %c0_7] : memref<256x256xbf16, #tpu.memory_space<vmem>>, vector<256x256xbf16>
    %cst_8 = arith.constant dense<0.000000e+00> : vector<8x256xf32>
    %10 = tpu.matmul %8, %9, %cst_8 {dimension_numbers = #tpu.dot_dimension_numbers<[1], [0], [0], [1], [0, 0, 1, 1], [], []>} : vector<8x256xbf16>, vector<256x256xbf16>, vector<8x256xf32> -> vector<8x256xf32>
    %c0_9 = arith.constant 0 : index
    %c0_10 = arith.constant 0 : index
    %11 = vector.load %arg4[%c0_9, %c0_10] : memref<1x256xf32, #tpu.memory_space<vmem>>, vector<1x256xf32>
    %12 = vector.broadcast %11 : vector<1x256xf32> to vector<8x256xf32>
    %13 = arith.addf %10, %12 : vector<8x256xf32>
    %cst_11 = arith.constant 0.000000e+00 : f32
    %14 = vector.broadcast %cst_11 : f32 to vector<8x256xf32>
    %15 = arith.maximumf %13, %14 : vector<8x256xf32>
    %16 = arith.truncf %15 : vector<8x256xf32> to vector<8x256xbf16>
    %c0_12 = arith.constant 0 : index
    %c0_13 = arith.constant 0 : index
    %17 = vector.load %arg5[%c0_12, %c0_13] : memref<256x8xbf16, #tpu.memory_space<vmem>>, vector<256x8xbf16>
    %cst_14 = arith.constant dense<0.000000e+00> : vector<8x8xf32>
    %18 = tpu.matmul %16, %17, %cst_14 {dimension_numbers = #tpu.dot_dimension_numbers<[1], [0], [0], [1], [0, 0, 1, 1], [], []>} : vector<8x256xbf16>, vector<256x8xbf16>, vector<8x8xf32> -> vector<8x8xf32>
    %c0_15 = arith.constant 0 : index
    %c0_16 = arith.constant 0 : index
    %19 = vector.load %arg6[%c0_15, %c0_16] : memref<1x8xf32, #tpu.memory_space<vmem>>, vector<1x8xf32>
    %20 = vector.broadcast %19 : vector<1x8xf32> to vector<8x8xf32>
    %21 = arith.addf %18, %20 : vector<8x8xf32>
    %c0_17 = arith.constant 0 : index
    %c0_18 = arith.constant 0 : index
    %22 = vector.load %arg7[%c0_17, %c0_18] : memref<8x8xf32, #tpu.memory_space<vmem>>, vector<8x8xf32>
    tpu.vector_store %arg7[%c0_17, %c0_18], %21 {strides = array<i32>} : memref<8x8xf32, #tpu.memory_space<vmem>>, vector<8x8xf32>,
    return
  }
}

</mosaic_0001>

<bundles_post_ra>
// kernel: tpu_custom_call.1
= control target key start
LH: loop header
LB: loop body
LE: loop exit
PB: predicated region body
PF: predicated region fallthrough
CT: control target
= control target key end

     0   :  { %12 = vsyncpa [#allocation3], 0  ;;  %s864_s0 = inlined_call_operand.vmem [shape: bf16[8,16], index: 0, kind: input, shape index: {}]   ;;  %s865_s1 = inlined_call_operand.vmem [shape: bf16[16,256], index: 1, kind: input, shape index: {}]   ;;  %s866_s2 = inlined_call_operand.vmem [shape: f32[1,256], index: 2, kind: input, shape index: {}]   ;;  %s867_s3 = inlined_call_operand.hbm [shape: bf16[256,256], index: 3, kind: input, shape index: {}]   ;;  %s868_s4 = inlined_call_operand.vmem [shape: f32[1,256], index: 4, kind: input, shape index: {}]   ;;  %s869_s5 = inlined_call_operand.vmem [shape: bf16[256,8], index: 5, kind: input, shape index: {}]   ;;  %s870_s6 = inlined_call_operand.vmem [shape: f32[1,8], index: 6, kind: input, shape index: {}]   ;;  %s871_s7 = inlined_call_operand.hbm [shape: f32[8,8], index: 7, kind: output, shape index: {}]  }
   0x1   :  { %13 = vsyncpa [#allocation4], 0  ;;  %s747_s24 = smov [#allocation2]  }
   0x2   :  { %s25_s25 = sshll.u32 %s747_s24, 4  ;;  %s26_s25 = int_to_ptr.vmem [resolvable:$true] %s25_s25 }
   0x3   :  { %s711_s26 = scalar_lea.vmem %s26_s25, 4096  ;;  %p716_p1 = scmp.lt.s32.totalorder %s26_s25, %s26_s25 }
   0x4   :  { %p712_p0 = scmp.ne.s32.totalorder %s26_s25, %s711_s26  ;;  %p717_p2 = scmp.lt.s32.totalorder %s711_s26, %s711_s26 }
   0x6   :  { %p718_p3 = por %p717_p2, %p716_p1 }
   0x8   :  { %p719_p4 = pnand %p718_p3, %p712_p0 }
   0xa   :  { %722 = shalt.err (!%p719_p4)
}
   0xb   :  { %s748_s27 = smov 128   ;;  %s749_s28 = smov 8  }
   0xc   :  { %31 = dma.hbm_to_vmem [thread:$0]  %s867_s3, 4096, %s26_s25, [#allocation3], %s748_s27, %s748_s27, %s749_s28  }
   0xd   :  { %743 = dma.done.wait [#allocation3], 4096  }
   0xe   :  { %744 = vsyncadd [#allocation3], 4294963200  ;;  %v750_v0 = vmov 0   ;;  %v636_v1 = vld [vmem:[%s865_s1 + $0x4] ss:$8 sps:$4 sm:$0xff]   ;;  %vm67_vm0 = vcmask 130048   ;;  %v47_v48 = vlaneseq }
   0xf   :  { %103 = vmatprep.mubr.bf16.mxu0 %v750_v0  ;;  %v638_v2 = vld [vmem:[%s865_s1] ss:$8 sps:$4 sm:$0xff]   ;;  %85 = vmatprep.subr.bf16.mxu0 %v636_v1  ;;  %v639_v4 = vld [vmem:[#allocation2 + $0x74] ss:$8 sps:$4 sm:$0xff]   ;;  %v641_v5 = vld [vmem:[#allocation2 + $0x70] ss:$8 sps:$4 sm:$0xff]  }
  0x10   :  { %v42_v3 = vld [vmem:[%s864_s0] sm:$0xf]  ;;  %86 = vmatpush1.bf16.msra.mxu0 %v638_v2  ;;  %v642_v6 = vld [vmem:[#allocation2 + $0x64] ss:$8 sps:$4 sm:$0xff]   ;;  %320 = vmatprep.subr.bf16.mxu1 %v639_v4  ;;  %v645_v8 = vld [vmem:[#allocation2 + $0x54] ss:$8 sps:$4 sm:$0xff]  }
  0x11   :  { %321 = vmatpush1.bf16.msra.mxu1 %v641_v5  ;;  %v644_v7 = vld [vmem:[#allocation2 + $0x60] ss:$8 sps:$4 sm:$0xff]   ;;  %v647_v9 = vld [vmem:[#allocation2 + $0x50] ss:$8 sps:$4 sm:$0xff]   ;;  %v648_v10 = vld [vmem:[#allocation2 + $0x44] ss:$8 sps:$4 sm:$0xff]  }
  0x12   :  { %322 = vmatprep.subr.bf16.mxu1 %v642_v6  ;;  %v650_v11 = vld [vmem:[#allocation2 + $0x40] ss:$8 sps:$4 sm:$0xff]   ;;  %v651_v12 = vld [vmem:[#allocation2 + $0x34] ss:$8 sps:$4 sm:$0xff]   ;;  %v653_v13 = vld [vmem:[#allocation2 + $0x30] ss:$8 sps:$4 sm:$0xff]  }
  0x13   :  { %559 = vmatmul.mubr.msk.bf16.vlgmr.msra.gmra.mxu0 %vm67_vm0, %v42_v3  ;;  %v654_v14 = vld [vmem:[#allocation2 + $0x24] ss:$8 sps:$4 sm:$0xff]   ;;  %v656_v15 = vld [vmem:[#allocation2 + $0x20] ss:$8 sps:$4 sm:$0xff]   ;;  %v657_v16 = vld [vmem:[#allocation2 + $0x14] ss:$8 sps:$4 sm:$0xff]  }
  0x14   :  { %v659_v17 = vld [vmem:[#allocation2 + $0x10] ss:$8 sps:$4 sm:$0xff]   ;;  %v660_v18 = vld [vmem:[#allocation2 + $0x4] ss:$8 sps:$4 sm:$0xff]   ;;  %v662_v19 = vld [vmem:[#allocation2] ss:$8 sps:$4 sm:$0xff]  }
  0x15   :  { %323 = vmatpush1.bf16.msra.mxu1 %v644_v7  ;;  %v663_v20 = vld [vmem:[#allocation2 + $0xf4] ss:$8 sps:$4 sm:$0xff]   ;;  %v665_v21 = vld [vmem:[#allocation2 + $0xf0] ss:$8 sps:$4 sm:$0xff]   ;;  %v666_v22 = vld [vmem:[#allocation2 + $0xe4] ss:$8 sps:$4 sm:$0xff]  }
  0x16   :  { %324 = vmatprep.subr.bf16.mxu1 %v645_v8  ;;  %v668_v23 = vld [vmem:[#allocation2 + $0xe0] ss:$8 sps:$4 sm:$0xff]   ;;  %v669_v24 = vld [vmem:[#allocation2 + $0xd4] ss:$8 sps:$4 sm:$0xff]   ;;  %v671_v25 = vld [vmem:[#allocation2 + $0xd0] ss:$8 sps:$4 sm:$0xff]  }
  0x17   :  { %v672_v26 = vld [vmem:[#allocation2 + $0xc4] ss:$8 sps:$4 sm:$0xff]   ;;  %v674_v27 = vld [vmem:[#allocation2 + $0xc0] ss:$8 sps:$4 sm:$0xff]   ;;  %v675_v28 = vld [vmem:[#allocation2 + $0xb4] ss:$8 sps:$4 sm:$0xff]  }
  0x18   :  { %v677_v29 = vld [vmem:[#allocation2 + $0xb0] ss:$8 sps:$4 sm:$0xff]   ;;  %v678_v30 = vld [vmem:[#allocation2 + $0xa4] ss:$8 sps:$4 sm:$0xff]   ;;  %v680_v31 = vld [vmem:[#allocation2 + $0xa0] ss:$8 sps:$4 sm:$0xff]  }
  0x19   :  { %325 = vmatpush1.bf16.msra.mxu1 %v647_v9  ;;  %v681_v32 = vld [vmem:[#allocation2 + $0x94] ss:$8 sps:$4 sm:$0xff]   ;;  %v683_v33 = vld [vmem:[#allocation2 + $0x90] ss:$8 sps:$4 sm:$0xff]   ;;  %v684_v34 = vld [vmem:[#allocation2 + $0x84] ss:$8 sps:$4 sm:$0xff]  }
  0x1a   :  { %326 = vmatprep.subr.bf16.mxu1 %v648_v10  ;;  %v686_v35 = vld [vmem:[#allocation2 + $0x80] ss:$8 sps:$4 sm:$0xff]   ;;  %v687_v36 = vld [vmem:[%s869_s5 + $0x78] sm:$0xff]   ;;  %v689_v38 = vld [vmem:[%s869_s5 + $0x70] sm:$0xff]   ;;  %v48_v49 = vshrl.u32 %v47_v48, 7  ;;  %vm540_vm1 = vcmask 64512  }
  0x1b   :  { %v688_v37 = vld [vmem:[%s869_s5 + $0x38] sm:$0xff]   ;;  %609 = vmatprep.subr.bf16.mxu0 %v687_v36  ;;  %v690_v39 = vld [vmem:[%s869_s5 + $0x30] sm:$0xff]   ;;  %v691_v40 = vld [vmem:[%s869_s5 + $0x68] sm:$0xff]  }
  0x1c   :  { %610 = vmatpush3.bf16.msra.mxu0 %v688_v37  ;;  %v692_v41 = vld [vmem:[%s869_s5 + $0x28] sm:$0xff]   ;;  %v693_v42 = vld [vmem:[%s869_s5 + $0x60] sm:$0xff]   ;;  %v695_v44 = vld [vmem:[%s869_s5 + $0x58] sm:$0xff]   ;;  %v49_v50 = vsub.s32 0, %v48_v49  ;;  %v53_v52 = vsub.s32 1, %v48_v49 }
  0x1d   :  { %327 = vmatpush1.bf16.msra.mxu1 %v650_v11  ;;  %611 = vmatprep.subr.bf16.mxu0 %v689_v38  ;;  %v694_v43 = vld [vmem:[%s869_s5 + $0x20] sm:$0xff]   ;;  %v696_v45 = vld [vmem:[%s869_s5 + $0x18] sm:$0xff]   ;;  %v697_v46 = vld [vmem:[%s869_s5 + $0x50] sm:$0xff]  }
  0x1e   :  { %328 = vmatprep.subr.bf16.mxu1 %v651_v12  ;;  %v698_v47 = vld [vmem:[%s869_s5 + $0x10] sm:$0xff]   ;;  %v45_v51 = vld [vmem:[%s866_s2] sm:$0x3]  ;;  %v699_v1 = vld [vmem:[%s869_s5 + $0x48] sm:$0xff]  }
  0x1f   :  { %v50_v53 = vrot.slane %v45_v51, %v49_v50  ;;  %v54_v54 = vrot.slane %v45_v51, %v53_v52  ;;  %v700_v2 = vld [vmem:[%s869_s5 + $0x8] sm:$0xff]   ;;  %v701_v3 = vld [vmem:[%s869_s5 + $0x40] sm:$0xff]  }
  0x20   :  { %612 = vmatpush3.bf16.msra.mxu0 %v690_v39  ;;  %v702_v4 = vld [vmem:[%s869_s5] sm:$0xff]  }
  0x21   :  { %329 = vmatpush1.bf16.msra.mxu1 %v653_v13  ;;  %613 = vmatprep.subr.bf16.mxu0 %v691_v40  ;;  %v148_v5 = vld [vmem:[%s868_s4] sm:$0x3]  ;;  %s751_s4 = smov [#allocation5]  }
  0x22   :  { %330 = vmatprep.subr.bf16.mxu1 %v654_v14  ;;  %v153_v6 = vrot.slane %v148_v5, %v49_v50  ;;  %v157_v7 = vrot.slane %v148_v5, %v53_v52  ;;  %s548_s21 = sshll.u32 %s751_s4, 4  ;;  %s549_s21 = int_to_ptr.vmem [resolvable:$true] %s548_s21 }
  0x23   :  { %s723_s22 = scalar_lea.vmem %s549_s21, 128  ;;  %p728_p6 = scmp.lt.s32.totalorder %s549_s21, %s549_s21 }
  0x24   :  { %614 = vmatpush3.bf16.msra.mxu0 %v692_v41  ;;  %p724_p5 = scmp.ne.s32.totalorder %s549_s21, %s723_s22  ;;  %p729_p7 = scmp.lt.s32.totalorder %s723_s22, %s723_s22 }
  0x25   :  { %331 = vmatpush1.bf16.msra.mxu1 %v656_v15  ;;  %615 = vmatprep.subr.bf16.mxu0 %v693_v42 }
  0x26   :  { %332 = vmatprep.subr.bf16.mxu1 %v657_v16  ;;  %p730_p8 = por %p729_p7, %p728_p6 }
  0x28   :  { %616 = vmatpush3.bf16.msra.mxu0 %v694_v43  ;;  %p731_p9 = pnand %p730_p8, %p724_p5 }
  0x29   :  { %333 = vmatpush1.bf16.msra.mxu1 %v659_v17  ;;  %617 = vmatprep.subr.bf16.mxu0 %v695_v44 }
  0x2a   :  { %334 = vmatprep.subr.bf16.mxu1 %v660_v18 }
  0x2c   :  { %618 = vmatpush3.bf16.msra.mxu0 %v696_v45 }
  0x2d   :  { %335 = vmatpush1.bf16.msra.mxu1 %v662_v19  ;;  %619 = vmatprep.subr.bf16.mxu0 %v697_v46  ;;  %v592_v19 = vld [vmem:[%s870_s6] ss:$0 sm:$0xff] }
  0x2e   :  { %336 = vmatprep.subr.bf16.mxu1 %v663_v20 }
  0x30   :  { %620 = vmatpush3.bf16.msra.mxu0 %v698_v47 }
  0x31   :  { %337 = vmatpush2.bf16.msra.mxu1 %v665_v21  ;;  %621 = vmatprep.subr.bf16.mxu0 %v699_v1 }
  0x32   :  { %338 = vmatprep.subr.bf16.mxu1 %v666_v22 }
  0x34   :  { %622 = vmatpush3.bf16.msra.mxu0 %v700_v2 }
  0x35   :  { %339 = vmatpush2.bf16.msra.mxu1 %v668_v23  ;;  %623 = vmatprep.subr.bf16.mxu0 %v701_v3 }
  0x36   :  { %340 = vmatprep.subr.bf16.mxu1 %v669_v24 }
  0x38   :  { %624 = vmatpush3.bf16.msra.mxu0 %v702_v4 }
  0x39   :  { %341 = vmatpush2.bf16.msra.mxu1 %v671_v25 }
  0x3a   :  { %342 = vmatprep.subr.bf16.mxu1 %v672_v26 }
  0x3d   :  { %343 = vmatpush2.bf16.msra.mxu1 %v674_v27 }
  0x3e   :  { %344 = vmatprep.subr.bf16.mxu1 %v675_v28 }
  0x41   :  { %345 = vmatpush2.bf16.msra.mxu1 %v677_v29 }
  0x42   :  { %346 = vmatprep.subr.bf16.mxu1 %v678_v30 }
  0x45   :  { %347 = vmatpush2.bf16.msra.mxu1 %v680_v31 }
  0x46   :  { %348 = vmatprep.subr.bf16.mxu1 %v681_v32 }
  0x49   :  { %349 = vmatpush2.bf16.msra.mxu1 %v683_v33 }
  0x4a   :  { %350 = vmatprep.subr.bf16.mxu1 %v684_v34 }
  0x4d   :  { %351 = vmatpush2.bf16.msra.mxu1 %v686_v35 }
  0xd3   :  { %v105_v55 = vpop.f32.mrf.mxu0 }
  0xd4   :  { %v106_v56 = vadd.f32 %v105_v55, %v50_v53 }
  0xd5   :  { %v107_v57 = vpop.f32.mrf.mxu0 }
  0xd6   :  { %v108_v58 = vadd.f32 %v107_v57, %v54_v54  ;;  %v112_v59 = vmax.f32 %v106_v56, 0.0 }
  0xd7   :  { %v109_v60 = vpop.f32.mrf.mxu0 }
  0xd8   :  { %v113_v61 = vmax.f32 %v108_v58, 0.0  ;;  %v114_v0 = vpack.c.bf16 %v112_v59, %v112_v59 }
  0xd9   :  { %v110_v62 = vpop.f32.mrf.mxu0 }
  0xda   :  { %v115_v63 = vpack.c.bf16 %v113_v61, %v113_v61 }
  0xdc   :  { %352 = vmatprep.mubr.bf16.mxu1 %v115_v63 }
  0xdd   :  { %353 = vmatmul.mubr.bf16.vlgmr.msra.gmra.mxu1 %v114_v0 }
 0x19d   :  { %v354_v8 = vpop.f32.mrf.mxu1 }
 0x19e   :  { %v355_v9 = vadd.f32 %v354_v8, %v153_v6 }
 0x19f   :  { %v356_v10 = vpop.f32.mrf.mxu1 }
 0x1a0   :  { %v357_v11 = vadd.f32 %v356_v10, %v157_v7  ;;  %v361_v12 = vmax.f32 %v355_v9, 0.0 }
 0x1a1   :  { %v358_v13 = vpop.f32.mrf.mxu1 }
 0x1a2   :  { %v362_v14 = vmax.f32 %v357_v11, 0.0  ;;  %v363_v17 = vpack.c.bf16 %v361_v12, %v361_v12 }
 0x1a3   :  { %v359_v15 = vpop.f32.mrf.mxu1 }
 0x1a4   :  { %v364_v16 = vpack.c.bf16 %v362_v14, %v362_v14 }
 0x1a6   :  { %532 = vmatprep.mubr.bf16.mxu0 %v364_v16 }
 0x1a7   :  { %533 = vmatmul.mubr.bf16.vlgmr.msra.gmra.mxu0 %v363_v17 }
 0x267   :  { %v625_v18 = vpop.f32.mrf.mxu0 }
 0x269   :  { %v626_v20 = vpop.f32.mrf.mxu0 }
 0x26a   :  { %v627_v21 = vadd.f32 %v626_v20, %v625_v18 }
 0x26b   :  { %v628_v22 = vpop.f32.mrf.mxu0 }
 0x26c   :  { %v535_v23 = vadd.f32 %v627_v21, %v592_v19 }
 0x26d   :  { %v629_v24 = vpop.f32.mrf.mxu0 }
 0x26e   :  { %541 = vst.msk [vmem:[#allocation5] sm:$0xff] %vm540_vm1, %v535_v23 }
 0x26f   :  { %734 = shalt.err (!%p731_p9)
}
 0x270   :  { %551 = dma.vmem_to_hbm [thread:$0]  %s549_s21, 128, %s871_s7, [#allocation4]  }
 0x271   :  { %745 = dma.done.wait [#allocation4], 128  }
 0x272   :  { %746 = vsyncadd [#allocation4], 4294967168 }
 0x273   :  { %555 = vsyncpa [#allocation3], 1 }
 0x274   :  { %556 = vsyncpa [#allocation4], 1 }

</bundles_post_ra>
